<compile_context>
chip_gen: v6e
topology: v6e:2x2x1
jax: 0.10.0
libtpu: 0.0.40
codegen_flags: <defaults>
</compile_context>

<pallas_src>
import jax
import jax.numpy as jnp
from jax.experimental import pallas as pl
from jax.experimental.pallas import tpu as pltpu


def _gelu_kernel(x_ref, o_ref):
    x = x_ref[...].astype(jnp.float32)
    # exact GELU (matches torch.nn.functional.gelu, approximate="none")
    inv_sqrt2 = 0.7071067811865476
    y = 0.5 * x * (1.0 + jax.lax.erf(x * inv_sqrt2))
    o_ref[...] = y.astype(o_ref.dtype)


_LANE = 128
_MAX_COLS = 8192
_TARGET_BLOCK_BYTES = 6 * 1024 * 1024   # ~6 MiB/block; 4 bufs (in+out, x2) = 24 MiB
_VMEM_LIMIT_BYTES = 48 * 1024 * 1024    # portable cap (< v7x 64 MiB physical)


def _sublane_rows(dtype) -> int:
    """Sublane packing multiple for the dtype (8 f32, 16 bf16, 32 int8/fp8)."""
    bits = jnp.dtype(dtype).itemsize * 8
    return max(8, 256 // bits)


def _pick_cols(n: int) -> int:
    """Largest power-of-two column count <= _MAX_COLS dividing n (n % 128 == 0)."""
    c = _LANE
    while c * 2 <= _MAX_COLS and n % (c * 2) == 0:
        c *= 2
    return c


def _ceil_to(v: int, m: int) -> int:
    return ((v + m - 1) // m) * m


def _compiler_params():
    return pltpu.CompilerParams(
        dimension_semantics=("parallel",),
        vmem_limit_bytes=_VMEM_LIMIT_BYTES,
    )


def gelu_pallas(x: jax.Array) -> jax.Array:
    """Elementwise exact GELU computed in a Pallas TPU kernel."""
    orig_shape = x.shape
    orig_dtype = x.dtype
    n = x.size
    if n == 0:
        return x

    itemsize = jnp.dtype(orig_dtype).itemsize
    sub = _sublane_rows(orig_dtype)

    cost = pl.CostEstimate(
        flops=30 * n,              # erf lowers to a sizeable polynomial
        transcendentals=n,
        bytes_accessed=2 * n * itemsize,
    )

    if n % _LANE == 0:
        # Common path: pure reshape (no copy), no padding.
        cols = _pick_cols(n)
        rows = n // cols
        x2d = x.reshape(rows, cols)

        # Block rows: target ~6 MiB blocks, multiple of the dtype sublane pack
        # (or the full row count for small inputs).
        tr = _TARGET_BLOCK_BYTES // (cols * itemsize)
        tr = max(sub, (tr // sub) * sub)
        if tr >= rows:
            tr = rows
        g = -(-rows // tr)

        # Megacore (v7x) balance: prefer >= 2 grid steps and an even count.
        if rows > sub and (g < 2 or g % 2 == 1):
            g_target = max(2, g + (g % 2))
            tr = _ceil_to(max(1, -(-rows // g_target)), sub)
            g = -(-rows // tr)

        out2d = pl.pallas_call(
            _gelu_kernel,
            out_shape=jax.ShapeDtypeStruct((rows, cols), orig_dtype),
            grid_spec=pltpu.PrefetchScalarGridSpec(
                num_scalar_prefetch=0,
                grid=(g,),
                in_specs=[pl.BlockSpec((tr, cols), lambda i: (i, 0))],
                out_specs=pl.BlockSpec((tr, cols), lambda i: (i, 0)),
            ),
            compiler_params=_compiler_params(),
            cost_estimate=cost,
        )(x2d)
        return out2d.reshape(orig_shape)

    # Ragged fallback (rare): flat 1-D view, Pallas masks the partial last
    # block -- no jnp.pad and no output slice (no extra HBM passes).
    x1d = x.reshape(-1)
    unit = sub * _LANE
    tb = max(unit, (_TARGET_BLOCK_BYTES // itemsize) // unit * unit)
    if tb >= n:
        tb = n  # single block equal to the full (unaligned) array
    g = -(-n // tb)

    out1d = pl.pallas_call(
        _gelu_kernel,
        out_shape=jax.ShapeDtypeStruct((n,), orig_dtype),
        grid_spec=pltpu.PrefetchScalarGridSpec(
            num_scalar_prefetch=0,
            grid=(g,),
            in_specs=[pl.BlockSpec((tb,), lambda i: (i,))],
            out_specs=pl.BlockSpec((tb,), lambda i: (i,)),
        ),
        compiler_params=_compiler_params(),
        cost_estimate=cost,
    )(x1d)
    return out1d.reshape(orig_shape)


if __name__ == "__main__":
    key = jax.random.PRNGKey(0)
    # Small NCHW-like input consistent with the module's usage.
    x = jax.random.normal(key, (2, 4, 16, 16), dtype=jnp.float32)

    y = gelu_pallas(x)
    jax.block_until_ready(y)

    # Sanity check against reference exact GELU.
    y_ref = 0.5 * x * (1.0 + jax.lax.erf(x / jnp.sqrt(2.0)))
    assert y.shape == x.shape and y.dtype == x.dtype
    assert float(jnp.max(jnp.abs(y - y_ref))) < 1e-5

    print("KERNEL_OK")
</pallas_src>

<mosaic_0001>
module attributes {stable_mosaic.version = 11 : i64} {
  func.func @_gelu_kernel(%arg0: i32, %arg1: memref<1x2048xf32, #tpu.memory_space<vmem>>, %arg2: memref<1x2048xf32, #tpu.memory_space<vmem>>) attributes {dimension_semantics = [#tpu.dimension_semantics<parallel>], iteration_bounds = array<i64: 1>, scalar_prefetch = 0 : i64, scratch_operands = 0 : i64, tpu.core_type = #tpu.core_type<tc>, window_params = [{transform_indices = @transform_0, window_bounds = array<i64: 1, 2048>}, {transform_indices = @transform_1, window_bounds = array<i64: 1, 2048>}]} {
    %c0 = arith.constant 0 : index
    %c0_0 = arith.constant 0 : index
    %0 = vector.load %arg1[%c0, %c0_0] : memref<1x2048xf32, #tpu.memory_space<vmem>>, vector<1x2048xf32>
    %cst = arith.constant 5.000000e-01 : f32
    %1 = vector.broadcast %cst : f32 to vector<1x2048xf32>
    %2 = arith.mulf %1, %0 : vector<1x2048xf32>
    %cst_1 = arith.constant 0.707106769 : f32
    %3 = vector.broadcast %cst_1 : f32 to vector<1x2048xf32>
    %4 = arith.mulf %0, %3 : vector<1x2048xf32>
    %5 = math.erf %4 : vector<1x2048xf32>
    %cst_2 = arith.constant 1.000000e+00 : f32
    %6 = vector.broadcast %cst_2 : f32 to vector<1x2048xf32>
    %7 = arith.addf %6, %5 : vector<1x2048xf32>
    %8 = arith.mulf %2, %7 : vector<1x2048xf32>
    %c0_3 = arith.constant 0 : index
    %c0_4 = arith.constant 0 : index
    %9 = vector.load %arg2[%c0_3, %c0_4] : memref<1x2048xf32, #tpu.memory_space<vmem>>, vector<1x2048xf32>
    tpu.vector_store %arg2[%c0_3, %c0_4], %8 {strides = array<i32>} : memref<1x2048xf32, #tpu.memory_space<vmem>>, vector<1x2048xf32>,
    return
  }
  func.func @transform_0(%arg0: i32) -> (i32, i32) {
    %c0_i32 = arith.constant 0 : i32
    %c0_i32_0 = arith.constant 0 : i32
    return %arg0, %c0_i32 : i32, i32
  }
  func.func @transform_1(%arg0: i32) -> (i32, i32) {
    %c0_i32 = arith.constant 0 : i32
    %c0_i32_0 = arith.constant 0 : i32
    return %arg0, %c0_i32 : i32, i32
  }
}

</mosaic_0001>

<bundles_post_ra>
// kernel: tpu_custom_call.1
= control target key start
LH: loop header
LB: loop body
LE: loop exit
PB: predicated region body
PF: predicated region fallthrough
CT: control target
= control target key end

     0   :  { %6 = vsyncpa [#allocation3], 0  ;;  %s118_s0 = inlined_call_operand.hbm [shape: f32[1,2048], index: 0, kind: input, shape index: {}]   ;;  %s119_s1 = inlined_call_operand.hbm [shape: f32[1,2048], index: 1, kind: output, shape index: {}]  }
   0x1   :  { %7 = vsyncpa [#allocation4], 0  ;;  %s100_s6 = smov [#allocation2]  }
   0x2   :  { %s14_s7 = sshll.u32 %s100_s6, 4  ;;  %s15_s7 = int_to_ptr.vmem [resolvable:$true] %s14_s7 }
   0x3   :  { %s64_s8 = scalar_lea.vmem %s15_s7, 256  ;;  %p69_p1 = scmp.lt.s32.totalorder %s15_s7, %s15_s7 }
   0x4   :  { %p65_p0 = scmp.ne.s32.totalorder %s15_s7, %s64_s8  ;;  %p70_p2 = scmp.lt.s32.totalorder %s64_s8, %s64_s8 }
   0x6   :  { %p71_p3 = por %p70_p2, %p69_p1 }
   0x8   :  { %p72_p4 = pnand %p71_p3, %p65_p0 }
   0xa   :  { %75 = shalt.err (!%p72_p4)
}
   0xb   :  { %17 = dma.hbm_to_vmem [thread:$0]  %s118_s0, 256, %s15_s7, [#allocation3]  }
   0xc   :  { %96 = dma.done.wait [#allocation3], 256  }
   0xd   :  { %97 = vsyncadd [#allocation3], 4294967040  ;;  %v21_v0 = vld [vmem:[#allocation2] sm:$0xff]  ;;  %v22_v1 = vld [vmem:[#allocation2 + $0x8] sm:$0xff]  ;;  %s101_s11 = smov [#allocation5]  }
   0xe   :  { %v25_v2 = vmul.f32 0.70710677, %v21_v0  ;;  %v26_v3 = vmul.f32 0.70710677, %v22_v1  ;;  %v23_v4 = vmul.f32 0.5, %v21_v0  ;;  %v24_v6 = vmul.f32 0.5, %v22_v1 }
   0xf   :  { %s41_s12 = sshll.u32 %s101_s11, 4  ;;  %s42_s12 = int_to_ptr.vmem [resolvable:$true] %s41_s12 }
  0x10   :  { %52 = verf.f32 %v25_v2  ;;  %s76_s0 = scalar_lea.vmem %s42_s12, 256  ;;  %p81_p6 = scmp.lt.s32.totalorder %s42_s12, %s42_s12 }
  0x11   :  { %54 = verf.f32 %v26_v3  ;;  %p77_p5 = scmp.ne.s32.totalorder %s42_s12, %s76_s0  ;;  %p82_p7 = scmp.lt.s32.totalorder %s76_s0, %s76_s0 }
  0x13   :  { %p83_p8 = por %p82_p7, %p81_p6 }
  0x15   :  { %p84_p9 = pnand %p83_p8, %p77_p5 }
  0x1d   :  { %v53_v5 = vpop.eup %52 }
  0x1e   :  { %v55_v7 = vpop.eup %54  ;;  %v29_v8 = vadd.f32 1.0, %v53_v5 }
  0x1f   :  { %v30_v9 = vadd.f32 1.0, %v55_v7 }
  0x20   :  { %v31_v10 = vmul.f32 %v29_v8, %v23_v4 }
  0x21   :  { %v32_v11 = vmul.f32 %v30_v9, %v24_v6 }
  0x22   :  { %33 = vst [vmem:[#allocation5] sm:$0xff] %v31_v10 }
  0x23   :  { %34 = vst [vmem:[#allocation5 + $0x8] sm:$0xff] %v32_v11 }
  0x24   :  { %87 = shalt.err (!%p84_p9)
}
  0x25   :  { %44 = dma.vmem_to_hbm [thread:$0]  %s42_s12, 256, %s119_s1, [#allocation4]  }
  0x26   :  { %98 = dma.done.wait [#allocation4], 256  }
  0x27   :  { %99 = vsyncadd [#allocation4], 4294967040 }
  0x28   :  { %48 = vsyncpa [#allocation3], 1 }
  0x29   :  { %49 = vsyncpa [#allocation4], 1 }

</bundles_post_ra>
